<compile_context>
chip_gen: v6e
topology: v6e:2x2x1
jax: 0.10.0
libtpu: 0.0.40
codegen_flags: <defaults>
</compile_context>

<pallas_src>
import functools

import jax
import jax.numpy as jnp
from jax.experimental import pallas as pl
from jax.experimental.pallas import tpu as pltpu


# ----------------------------- Pallas kernel ------------------------------


def _glow_kernel(depth, dim,
                 x_ref,                       # (dim, block_b)     batch on lanes
                 an_scale_ref, an_bias_ref,   # (dim, 1)           exp(log_scale), bias
                 a_ref,                       # (depth, dim+Hp, dim)  [W ; fc1_pad @ W]
                 fc1b_ref,                    # (depth, Hp, 1)
                 fcstw_ref, fcstb_ref,        # (depth, 2*dim, Hp), (depth, 2*dim, 1)
                 o_ref):                      # (dim, block_b)
    """Whole flow applied to one lane-dense (dim, block_b) batch tile, fully in vregs.

    Column layout: a PyTorch Linear y = x @ W^T becomes y_col = W @ x_col, so all
    weights are used in their native (out, in) orientation and biases broadcast
    along the lane (batch) axis.
    """
    f32 = jnp.float32

    # --- ActNorm: y = x * exp(log_scale) + bias (scale pre-exponentiated in wrapper) ---
    xk = x_ref[...].astype(f32) * an_scale_ref[...] + an_bias_ref[...]     # (dim, B)

    # --- depth x (InvertibleLinear, NonexponentialAffineCoupling) ----------------------
    for k in range(depth):                        # depth is static -> unrolled
        # One fused MXU push: rows [:dim] = W @ x (the new activation y),
        #                     rows [dim:] = fc1_pad @ W @ x (the coupling-NN pre-hidden).
        yh = jnp.dot(a_ref[k], xk, preferred_element_type=f32)             # (dim+Hp, B)
        y = yh[:dim, :]                                                    # (dim, B)
        h = jnp.maximum(yh[dim:, :] + fc1b_ref[k], 0.0)                    # (Hp, B)

        # Fused (s, t) head; rows for the pass-through half are zero-padded,
        # so no split / concat / partial store is needed below.
        st = jnp.dot(fcstw_ref[k], h, preferred_element_type=f32) + fcstb_ref[k]  # (2*dim, B)
        s = jnp.tanh(st[:dim, :])                                          # (dim, B)
        t = st[dim:, :]                                                    # (dim, B)

        # Non-exponential affine coupling on the full vector:
        #   first half: s = 0, t = 0  ->  unchanged (identity)
        #   second half: (1 + s) * y2 + t
        xk = (1.0 + s) * y + t

    o_ref[...] = xk.astype(o_ref.dtype)


# ----------------------------- wrapper -------------------------------------


def glow_nonexponential_forward(x, params, *, block_b=None):
    """x: (N, dim) float32.  params: dict of stacked per-layer parameters.

    Returns (N, dim); internally runs batch-on-lanes (dim, N) through the kernel.
    """
    N, dim = x.shape
    d = dim // 2
    n_out = dim - d
    depth = params["w"].shape[0]
    n_hidden = params["fc1_w"].shape[1]
    hp = -(-n_hidden // 8) * 8                 # hidden width padded to a sublane multiple

    if block_b is None:
        block_b = min(N, 1024)
        if N >= 256:                           # keep >=2 parallel grid steps (v7x: 2 TCs)
            block_b = min(block_b, N // 2)
    assert N % block_b == 0, "batch must be divisible by block_b"
    assert block_b % 8 == 0                    # prefer a multiple of 128 for lane-dense stores

    f32 = jnp.float32

    # Batch-on-lanes layout.
    x_t = x.T                                                     # (dim, N)

    # --- Hoisted / packed parameters (column layout: weights stay (out, in)) ---
    an_scale = jnp.exp(params["an_logs"]).astype(f32).reshape(dim, 1)
    an_bias = params["an_bias"].astype(f32).reshape(dim, 1)
    w = params["w"].astype(f32)                                   # (depth, dim, dim)

    # fc1 zero-padded: input cols [d:] -> 0 (only x1 feeds the NN), rows [n_hidden:hp] -> 0.
    fc1w_pad = jnp.zeros((depth, hp, dim), f32).at[:, :n_hidden, :d].set(params["fc1_w"])
    fc1b_pad = jnp.zeros((depth, hp, 1), f32).at[:, :n_hidden, :].set(params["fc1_b"])

    # Fused per-layer matrix A_k = [W_k ; fc1_pad_k @ W_k]  -> one MXU push for (y, pre_h).
    a = jnp.concatenate([w, jnp.einsum("khd,kdi->khi", fc1w_pad, w)], axis=1)  # (depth, dim+hp, dim)

    # Fused (s, t) head, zero-padded to full `dim` rows (pass-through half gets s=0, t=0)
    # and to hp columns.
    fcst_w = jnp.zeros((depth, 2 * dim, hp), f32)
    fcst_w = fcst_w.at[:, d:dim, :n_hidden].set(params["fcs_w"])
    fcst_w = fcst_w.at[:, dim + d:, :n_hidden].set(params["fct_w"])
    fcst_b = jnp.zeros((depth, 2 * dim, 1), f32)
    fcst_b = fcst_b.at[:, d:dim, :].set(params["fcs_b"])
    fcst_b = fcst_b.at[:, dim + d:, :].set(params["fct_b"])

    kernel = functools.partial(_glow_kernel, depth, dim)

    def whole(arr):
        # full-array block, constant index across the grid (no re-DMA between steps)
        nd = arr.ndim
        return pl.BlockSpec(arr.shape, lambda i, _nd=nd: (0,) * _nd)

    out_t = pl.pallas_call(
        kernel,
        out_shape=jax.ShapeDtypeStruct((dim, N), x.dtype),
        grid_spec=pltpu.PrefetchScalarGridSpec(
            num_scalar_prefetch=0,
            grid=(N // block_b,),
            in_specs=[
                pl.BlockSpec((dim, block_b), lambda i: (0, i)),   # x: lane-dense batch tile
                whole(an_scale), whole(an_bias),
                whole(a),
                whole(fc1b_pad),
                whole(fcst_w), whole(fcst_b),
            ],
            out_specs=pl.BlockSpec((dim, block_b), lambda i: (0, i)),
            scratch_shapes=[],
        ),
        compiler_params=pltpu.CompilerParams(
            dimension_semantics=("parallel",)),
    )(x_t, an_scale, an_bias, a, fc1b_pad, fcst_w, fcst_b)

    return out_t.T                                                # back to (N, dim)


# ----------------------------- reference (pure JAX) -------------------------


def glow_nonexponential_ref(x, params):
    """Row-layout reference matching the PyTorch module semantics."""
    dim = x.shape[1]
    d = dim // 2
    x = x * jnp.exp(params["an_logs"])[None, :] + params["an_bias"][None, :]
    depth = params["w"].shape[0]
    for k in range(depth):
        x = x @ params["w"][k].T                                  # InvertibleLinear: y = x W^T
        x1, x2 = x[:, :d], x[:, d:]
        h = jax.nn.relu(x1 @ params["fc1_w"][k].T + params["fc1_b"][k].T)
        s = jnp.tanh(h @ params["fcs_w"][k].T + params["fcs_b"][k].T)
        t = h @ params["fct_w"][k].T + params["fct_b"][k].T
        x = jnp.concatenate([x1, (1.0 + s) * x2 + t], axis=-1)
    return x


# ----------------------------- param init ----------------------------------


def init_params(key, depth, dim, n_hidden):
    """Deterministic init (mirrors _NN.randomize_weights-style scaling).

    Weights are stored in the PyTorch (out, in) orientation; biases as column vectors.
    """
    d = dim // 2
    n_out = dim - d
    ks = jax.random.split(key, 10)
    f32 = jnp.float32

    return {
        # ActNorm
        "an_logs": 0.1 * jax.random.normal(ks[0], (dim,), f32),
        "an_bias": 0.1 * jax.random.normal(ks[1], (dim,), f32),
        # InvertibleLinear W : (depth, dim, dim), y = x @ W^T
        "w": (jnp.tile(jnp.eye(dim, dtype=f32)[None], (depth, 1, 1))
              + 0.1 * jax.random.normal(ks[2], (depth, dim, dim), f32)),
        # _NN per coupling layer
        "fc1_w": jax.random.normal(ks[3], (depth, n_hidden, d), f32) / d,
        "fc1_b": 0.1 * jax.random.normal(ks[4], (depth, n_hidden, 1), f32),
        "fcs_w": jax.random.normal(ks[5], (depth, n_out, n_hidden), f32) / n_hidden,
        "fcs_b": 0.1 * jax.random.normal(ks[6], (depth, n_out, 1), f32),
        "fct_w": jax.random.normal(ks[7], (depth, n_out, n_hidden), f32) / n_hidden,
        "fct_b": 0.1 * jax.random.normal(ks[8], (depth, n_out, 1), f32),
    }


# ----------------------------- main -----------------------------------------


if __name__ == "__main__":
    depth, dim, n_hidden = 3, 8, 20        # GlowNonExponential(depth=3, dim=8, n_hidden=20)
    N = 512                                 # batch
    block_b = 256                           # lane-dense tiles, 2 parallel grid steps

    key = jax.random.PRNGKey(0)
    kx, kp = jax.random.split(key)
    x = jax.random.normal(kx, (N, dim), jnp.float32)
    params = init_params(kp, depth, dim, n_hidden)

    out = glow_nonexponential_forward(x, params, block_b=block_b)
    out = jax.block_until_ready(out)

    ref = glow_nonexponential_ref(x, params)
    assert out.shape == (N, dim) and out.dtype == jnp.float32
    assert jnp.allclose(out, ref, atol=1e-4, rtol=1e-4), "mismatch vs reference"

    print("KERNEL_OK")
</pallas_src>

<mosaic_0001>
module attributes {stable_mosaic.version = 11 : i64} {
  func.func @_glow_kernel(%arg0: i32, %arg1: memref<8x256xf32, #tpu.memory_space<vmem>>, %arg2: memref<8x1xf32, #tpu.memory_space<vmem>>, %arg3: memref<8x1xf32, #tpu.memory_space<vmem>>, %arg4: memref<3x32x8xf32, #tpu.memory_space<vmem>>, %arg5: memref<3x24x1xf32, #tpu.memory_space<vmem>>, %arg6: memref<3x16x24xf32, #tpu.memory_space<vmem>>, %arg7: memref<3x16x1xf32, #tpu.memory_space<vmem>>, %arg8: memref<8x256xf32, #tpu.memory_space<vmem>>) attributes {dimension_semantics = [#tpu.dimension_semantics<parallel>], iteration_bounds = array<i64: 2>, scalar_prefetch = 0 : i64, scratch_operands = 0 : i64, tpu.core_type = #tpu.core_type<tc>, window_params = [{transform_indices = @transform_0, window_bounds = array<i64: 8, 256>}, {pipeline_mode = #tpu.pipeline_mode<synchronous>, transform_indices = @transform_1, window_bounds = array<i64: 8, 1>}, {pipeline_mode = #tpu.pipeline_mode<synchronous>, transform_indices = @transform_2, window_bounds = array<i64: 8, 1>}, {pipeline_mode = #tpu.pipeline_mode<synchronous>, transform_indices = @transform_3, window_bounds = array<i64: 3, 32, 8>}, {pipeline_mode = #tpu.pipeline_mode<synchronous>, transform_indices = @transform_4, window_bounds = array<i64: 3, 24, 1>}, {pipeline_mode = #tpu.pipeline_mode<synchronous>, transform_indices = @transform_5, window_bounds = array<i64: 3, 16, 24>}, {pipeline_mode = #tpu.pipeline_mode<synchronous>, transform_indices = @transform_6, window_bounds = array<i64: 3, 16, 1>}, {transform_indices = @transform_7, window_bounds = array<i64: 8, 256>}]} {
    %c0 = arith.constant 0 : index
    %c0_0 = arith.constant 0 : index
    %0 = vector.load %arg1[%c0, %c0_0] : memref<8x256xf32, #tpu.memory_space<vmem>>, vector<8x256xf32>
    %c0_1 = arith.constant 0 : index
    %c0_2 = arith.constant 0 : index
    %1 = vector.load %arg2[%c0_1, %c0_2] : memref<8x1xf32, #tpu.memory_space<vmem>>, vector<8x1xf32>
    %2 = vector.broadcast %1 : vector<8x1xf32> to vector<8x256xf32>
    %3 = arith.mulf %0, %2 : vector<8x256xf32>
    %c0_3 = arith.constant 0 : index
    %c0_4 = arith.constant 0 : index
    %4 = vector.load %arg3[%c0_3, %c0_4] : memref<8x1xf32, #tpu.memory_space<vmem>>, vector<8x1xf32>
    %5 = vector.broadcast %4 : vector<8x1xf32> to vector<8x256xf32>
    %6 = arith.addf %3, %5 : vector<8x256xf32>
    %c0_5 = arith.constant 0 : index
    %c0_6 = arith.constant 0 : index
    %c0_7 = arith.constant 0 : index
    %7 = vector.load %arg4[%c0_5, %c0_6, %c0_7] : memref<3x32x8xf32, #tpu.memory_space<vmem>>, vector<1x32x8xf32>
    %8 = vector.shape_cast %7 : vector<1x32x8xf32> to vector<32x8xf32>
    %cst = arith.constant dense<0.000000e+00> : vector<32x256xf32>
    %9 = tpu.matmul %8, %6, %cst {dimension_numbers = #tpu.dot_dimension_numbers<[1], [0], [0], [1], [0, 0, 1, 1], [], []>} : vector<32x8xf32>, vector<8x256xf32>, vector<32x256xf32> -> vector<32x256xf32>
    %10 = vector.extract_strided_slice %9 {offsets = [0, 0], sizes = [8, 256], strides = [1, 1]} : vector<32x256xf32> to vector<8x256xf32>
    %11 = vector.extract_strided_slice %9 {offsets = [8, 0], sizes = [24, 256], strides = [1, 1]} : vector<32x256xf32> to vector<24x256xf32>
    %c0_8 = arith.constant 0 : index
    %c0_9 = arith.constant 0 : index
    %c0_10 = arith.constant 0 : index
    %12 = vector.load %arg5[%c0_8, %c0_9, %c0_10] : memref<3x24x1xf32, #tpu.memory_space<vmem>>, vector<1x24x1xf32>
    %13 = vector.shape_cast %12 : vector<1x24x1xf32> to vector<24x1xf32>
    %14 = vector.broadcast %13 : vector<24x1xf32> to vector<24x256xf32>
    %15 = arith.addf %11, %14 : vector<24x256xf32>
    %cst_11 = arith.constant 0.000000e+00 : f32
    %16 = vector.broadcast %cst_11 : f32 to vector<24x256xf32>
    %17 = arith.maximumf %15, %16 : vector<24x256xf32>
    %c0_12 = arith.constant 0 : index
    %c0_13 = arith.constant 0 : index
    %c0_14 = arith.constant 0 : index
    %18 = vector.load %arg6[%c0_12, %c0_13, %c0_14] : memref<3x16x24xf32, #tpu.memory_space<vmem>>, vector<1x16x24xf32>
    %19 = vector.shape_cast %18 : vector<1x16x24xf32> to vector<16x24xf32>
    %cst_15 = arith.constant dense<0.000000e+00> : vector<16x256xf32>
    %20 = tpu.matmul %19, %17, %cst_15 {dimension_numbers = #tpu.dot_dimension_numbers<[1], [0], [0], [1], [0, 0, 1, 1], [], []>} : vector<16x24xf32>, vector<24x256xf32>, vector<16x256xf32> -> vector<16x256xf32>
    %c0_16 = arith.constant 0 : index
    %c0_17 = arith.constant 0 : index
    %c0_18 = arith.constant 0 : index
    %21 = vector.load %arg7[%c0_16, %c0_17, %c0_18] : memref<3x16x1xf32, #tpu.memory_space<vmem>>, vector<1x16x1xf32>
    %22 = vector.shape_cast %21 : vector<1x16x1xf32> to vector<16x1xf32>
    %23 = vector.broadcast %22 : vector<16x1xf32> to vector<16x256xf32>
    %24 = arith.addf %20, %23 : vector<16x256xf32>
    %25 = vector.extract_strided_slice %24 {offsets = [0, 0], sizes = [8, 256], strides = [1, 1]} : vector<16x256xf32> to vector<8x256xf32>
    %26 = math.tanh %25 : vector<8x256xf32>
    %27 = vector.extract_strided_slice %24 {offsets = [8, 0], sizes = [8, 256], strides = [1, 1]} : vector<16x256xf32> to vector<8x256xf32>
    %cst_19 = arith.constant 1.000000e+00 : f32
    %28 = vector.broadcast %cst_19 : f32 to vector<8x256xf32>
    %29 = arith.addf %28, %26 : vector<8x256xf32>
    %30 = arith.mulf %29, %10 : vector<8x256xf32>
    %31 = arith.addf %30, %27 : vector<8x256xf32>
    %c1 = arith.constant 1 : index
    %c0_20 = arith.constant 0 : index
    %c0_21 = arith.constant 0 : index
    %32 = vector.load %arg4[%c1, %c0_20, %c0_21] : memref<3x32x8xf32, #tpu.memory_space<vmem>>, vector<1x32x8xf32>
    %33 = vector.shape_cast %32 : vector<1x32x8xf32> to vector<32x8xf32>
    %cst_22 = arith.constant dense<0.000000e+00> : vector<32x256xf32>
    %34 = tpu.matmul %33, %31, %cst_22 {dimension_numbers = #tpu.dot_dimension_numbers<[1], [0], [0], [1], [0, 0, 1, 1], [], []>} : vector<32x8xf32>, vector<8x256xf32>, vector<32x256xf32> -> vector<32x256xf32>
    %35 = vector.extract_strided_slice %34 {offsets = [0, 0], sizes = [8, 256], strides = [1, 1]} : vector<32x256xf32> to vector<8x256xf32>
    %36 = vector.extract_strided_slice %34 {offsets = [8, 0], sizes = [24, 256], strides = [1, 1]} : vector<32x256xf32> to vector<24x256xf32>
    %c1_23 = arith.constant 1 : index
    %c0_24 = arith.constant 0 : index
    %c0_25 = arith.constant 0 : index
    %37 = vector.load %arg5[%c1_23, %c0_24, %c0_25] : memref<3x24x1xf32, #tpu.memory_space<vmem>>, vector<1x24x1xf32>
    %38 = vector.shape_cast %37 : vector<1x24x1xf32> to vector<24x1xf32>
    %39 = vector.broadcast %38 : vector<24x1xf32> to vector<24x256xf32>
    %40 = arith.addf %36, %39 : vector<24x256xf32>
    %cst_26 = arith.constant 0.000000e+00 : f32
    %41 = vector.broadcast %cst_26 : f32 to vector<24x256xf32>
    %42 = arith.maximumf %40, %41 : vector<24x256xf32>
    %c1_27 = arith.constant 1 : index
    %c0_28 = arith.constant 0 : index
    %c0_29 = arith.constant 0 : index
    %43 = vector.load %arg6[%c1_27, %c0_28, %c0_29] : memref<3x16x24xf32, #tpu.memory_space<vmem>>, vector<1x16x24xf32>
    %44 = vector.shape_cast %43 : vector<1x16x24xf32> to vector<16x24xf32>
    %cst_30 = arith.constant dense<0.000000e+00> : vector<16x256xf32>
    %45 = tpu.matmul %44, %42, %cst_30 {dimension_numbers = #tpu.dot_dimension_numbers<[1], [0], [0], [1], [0, 0, 1, 1], [], []>} : vector<16x24xf32>, vector<24x256xf32>, vector<16x256xf32> -> vector<16x256xf32>
    %c1_31 = arith.constant 1 : index
    %c0_32 = arith.constant 0 : index
    %c0_33 = arith.constant 0 : index
    %46 = vector.load %arg7[%c1_31, %c0_32, %c0_33] : memref<3x16x1xf32, #tpu.memory_space<vmem>>, vector<1x16x1xf32>
    %47 = vector.shape_cast %46 : vector<1x16x1xf32> to vector<16x1xf32>
    %48 = vector.broadcast %47 : vector<16x1xf32> to vector<16x256xf32>
    %49 = arith.addf %45, %48 : vector<16x256xf32>
    %50 = vector.extract_strided_slice %49 {offsets = [0, 0], sizes = [8, 256], strides = [1, 1]} : vector<16x256xf32> to vector<8x256xf32>
    %51 = math.tanh %50 : vector<8x256xf32>
    %52 = vector.extract_strided_slice %49 {offsets = [8, 0], sizes = [8, 256], strides = [1, 1]} : vector<16x256xf32> to vector<8x256xf32>
    %cst_34 = arith.constant 1.000000e+00 : f32
    %53 = vector.broadcast %cst_34 : f32 to vector<8x256xf32>
    %54 = arith.addf %53, %51 : vector<8x256xf32>
    %55 = arith.mulf %54, %35 : vector<8x256xf32>
    %56 = arith.addf %55, %52 : vector<8x256xf32>
    %c2 = arith.constant 2 : index
    %c0_35 = arith.constant 0 : index
    %c0_36 = arith.constant 0 : index
    %57 = vector.load %arg4[%c2, %c0_35, %c0_36] : memref<3x32x8xf32, #tpu.memory_space<vmem>>, vector<1x32x8xf32>
    %58 = vector.shape_cast %57 : vector<1x32x8xf32> to vector<32x8xf32>
    %cst_37 = arith.constant dense<0.000000e+00> : vector<32x256xf32>
    %59 = tpu.matmul %58, %56, %cst_37 {dimension_numbers = #tpu.dot_dimension_numbers<[1], [0], [0], [1], [0, 0, 1, 1], [], []>} : vector<32x8xf32>, vector<8x256xf32>, vector<32x256xf32> -> vector<32x256xf32>
    %60 = vector.extract_strided_slice %59 {offsets = [0, 0], sizes = [8, 256], strides = [1, 1]} : vector<32x256xf32> to vector<8x256xf32>
    %61 = vector.extract_strided_slice %59 {offsets = [8, 0], sizes = [24, 256], strides = [1, 1]} : vector<32x256xf32> to vector<24x256xf32>
    %c2_38 = arith.constant 2 : index
    %c0_39 = arith.constant 0 : index
    %c0_40 = arith.constant 0 : index
    %62 = vector.load %arg5[%c2_38, %c0_39, %c0_40] : memref<3x24x1xf32, #tpu.memory_space<vmem>>, vector<1x24x1xf32>
    %63 = vector.shape_cast %62 : vector<1x24x1xf32> to vector<24x1xf32>
    %64 = vector.broadcast %63 : vector<24x1xf32> to vector<24x256xf32>
    %65 = arith.addf %61, %64 : vector<24x256xf32>
    %cst_41 = arith.constant 0.000000e+00 : f32
    %66 = vector.broadcast %cst_41 : f32 to vector<24x256xf32>
    %67 = arith.maximumf %65, %66 : vector<24x256xf32>
    %c2_42 = arith.constant 2 : index
    %c0_43 = arith.constant 0 : index
    %c0_44 = arith.constant 0 : index
    %68 = vector.load %arg6[%c2_42, %c0_43, %c0_44] : memref<3x16x24xf32, #tpu.memory_space<vmem>>, vector<1x16x24xf32>
    %69 = vector.shape_cast %68 : vector<1x16x24xf32> to vector<16x24xf32>
    %cst_45 = arith.constant dense<0.000000e+00> : vector<16x256xf32>
    %70 = tpu.matmul %69, %67, %cst_45 {dimension_numbers = #tpu.dot_dimension_numbers<[1], [0], [0], [1], [0, 0, 1, 1], [], []>} : vector<16x24xf32>, vector<24x256xf32>, vector<16x256xf32> -> vector<16x256xf32>
    %c2_46 = arith.constant 2 : index
    %c0_47 = arith.constant 0 : index
    %c0_48 = arith.constant 0 : index
    %71 = vector.load %arg7[%c2_46, %c0_47, %c0_48] : memref<3x16x1xf32, #tpu.memory_space<vmem>>, vector<1x16x1xf32>
    %72 = vector.shape_cast %71 : vector<1x16x1xf32> to vector<16x1xf32>
    %73 = vector.broadcast %72 : vector<16x1xf32> to vector<16x256xf32>
    %74 = arith.addf %70, %73 : vector<16x256xf32>
    %75 = vector.extract_strided_slice %74 {offsets = [0, 0], sizes = [8, 256], strides = [1, 1]} : vector<16x256xf32> to vector<8x256xf32>
    %76 = math.tanh %75 : vector<8x256xf32>
    %77 = vector.extract_strided_slice %74 {offsets = [8, 0], sizes = [8, 256], strides = [1, 1]} : vector<16x256xf32> to vector<8x256xf32>
    %cst_49 = arith.constant 1.000000e+00 : f32
    %78 = vector.broadcast %cst_49 : f32 to vector<8x256xf32>
    %79 = arith.addf %78, %76 : vector<8x256xf32>
    %80 = arith.mulf %79, %60 : vector<8x256xf32>
    %81 = arith.addf %80, %77 : vector<8x256xf32>
    %c0_50 = arith.constant 0 : index
    %c0_51 = arith.constant 0 : index
    %82 = vector.load %arg8[%c0_50, %c0_51] : memref<8x256xf32, #tpu.memory_space<vmem>>, vector<8x256xf32>
    tpu.vector_store %arg8[%c0_50, %c0_51], %81 {strides = array<i32>} : memref<8x256xf32, #tpu.memory_space<vmem>>, vector<8x256xf32>,
    return
  }
  func.func @transform_0(%arg0: i32) -> (i32, i32) {
    %c0_i32 = arith.constant 0 : i32
    %c0_i32_0 = arith.constant 0 : i32
    return %c0_i32, %arg0 : i32, i32
  }
  func.func @transform_1(%arg0: i32) -> (i32, i32) {
    %c0_i32 = arith.constant 0 : i32
    %c0_i32_0 = arith.constant 0 : i32
    %c0_i32_1 = arith.constant 0 : i32
    return %c0_i32, %c0_i32_0 : i32, i32
  }
  func.func @transform_2(%arg0: i32) -> (i32, i32) {
    %c0_i32 = arith.constant 0 : i32
    %c0_i32_0 = arith.constant 0 : i32
    %c0_i32_1 = arith.constant 0 : i32
    return %c0_i32, %c0_i32_0 : i32, i32
  }
  func.func @transform_3(%arg0: i32) -> (i32, i32, i32) {
    %c0_i32 = arith.constant 0 : i32
    %c0_i32_0 = arith.constant 0 : i32
    %c0_i32_1 = arith.constant 0 : i32
    %c0_i32_2 = arith.constant 0 : i32
    return %c0_i32, %c0_i32_0, %c0_i32_1 : i32, i32, i32
  }
  func.func @transform_4(%arg0: i32) -> (i32, i32, i32) {
    %c0_i32 = arith.constant 0 : i32
    %c0_i32_0 = arith.constant 0 : i32
    %c0_i32_1 = arith.constant 0 : i32
    %c0_i32_2 = arith.constant 0 : i32
    return %c0_i32, %c0_i32_0, %c0_i32_1 : i32, i32, i32
  }
  func.func @transform_5(%arg0: i32) -> (i32, i32, i32) {
    %c0_i32 = arith.constant 0 : i32
    %c0_i32_0 = arith.constant 0 : i32
    %c0_i32_1 = arith.constant 0 : i32
    %c0_i32_2 = arith.constant 0 : i32
    return %c0_i32, %c0_i32_0, %c0_i32_1 : i32, i32, i32
  }
  func.func @transform_6(%arg0: i32) -> (i32, i32, i32) {
    %c0_i32 = arith.constant 0 : i32
    %c0_i32_0 = arith.constant 0 : i32
    %c0_i32_1 = arith.constant 0 : i32
    %c0_i32_2 = arith.constant 0 : i32
    return %c0_i32, %c0_i32_0, %c0_i32_1 : i32, i32, i32
  }
  func.func @transform_7(%arg0: i32) -> (i32, i32) {
    %c0_i32 = arith.constant 0 : i32
    %c0_i32_0 = arith.constant 0 : i32
    return %c0_i32, %arg0 : i32, i32
  }
}

</mosaic_0001>

<bundles_post_ra>
// kernel: tpu_custom_call.1
= control target key start
LH: loop header
LB: loop body
LE: loop exit
PB: predicated region body
PF: predicated region fallthrough
CT: control target
= control target key end

     0   :  { %12 = vsyncpa [#allocation3], 0  ;;  %s1544_s0 = inlined_call_operand.vmem [shape: f32[8,512], index: 0, kind: input, shape index: {}]   ;;  %s1545_s1 = inlined_call_operand.vmem [shape: f32[8,1], index: 1, kind: input, shape index: {}]   ;;  %s1546_s2 = inlined_call_operand.vmem [shape: f32[8,1], index: 2, kind: input, shape index: {}]   ;;  %s1547_s3 = inlined_call_operand.vmem [shape: f32[3,32,8], index: 3, kind: input, shape index: {}]   ;;  %s1548_s4 = inlined_call_operand.vmem [shape: f32[3,24,1], index: 4, kind: input, shape index: {}]   ;;  %s1549_s5 = inlined_call_operand.vmem [shape: f32[3,16,24], index: 5, kind: input, shape index: {}]   ;;  %s1550_s6 = inlined_call_operand.vmem [shape: f32[3,16,1], index: 6, kind: input, shape index: {}]   ;;  %s1551_s7 = inlined_call_operand.hbm [shape: f32[8,512], index: 7, kind: output, shape index: {}]  }
   0x1   :  { %14 = vsyncpa [#allocation3 + $0x1], 0  ;;  %s1317_s24 = smov 0   ;;  %s1319_s25 = smov 0  }
   0x2   :  { %s1321_s26 = smov 0   ;;  %s1323_s27 = smov 0  }
   0x3 LB: > { %s1338_s28 = sadd.s32 4294967295, %s1272_s27   ;;  %s1104_s29 = sadd.s32 4294967294, %s1272_s27   ;;  %s1272_s27 = sphi %s1323_s27, %s1557_s27   ;;  %s1268_s26 = sphi %s1321_s26, %s1556_s26   ;;  %s1264_s25 = sphi %s1319_s25, %s1555_s25   ;;  %s1260_s24 = sphi %s1317_s24, %s1554_s24  }
   0x4   : > { %s1342_s30 = sadd.s32 1, %s1272_s27   ;;  %s179_s8 = sadd.s32 1, %s1268_s26 }
   0x5   : > { %s176_s9 = ssub.s32 %s1272_s27, %s1342_s30  ;;  %p189_p0 = scmp.ne.s32.totalorder %s1268_s26, %s1264_s25 }
   0x6   : > { %p177_p1 = scmp.eq.s32.totalorder %s176_s9, 0  ;;  %p190_p2 = scmp.eq.s32.totalorder %s1338_s28, 1 }
   0x7   : > { %p195_p3 = scmp.ne.s32.totalorder %s1264_s25, %s1260_s24  ;;  %p196_p4 = scmp.eq.s32.totalorder %s1104_s29, 1 }
   0x8   : > { %s1353_s10 = scalar_select %p177_p1, %s1268_s26, %s179_s8  }
   0x9   : > { %p1355_p5 = por %p190_p2, %p189_p0  ;;  %p1359_p6 = por %p196_p4, %p195_p3 }
   0xa   : > { %p1107_p7 = scmp.ge.s32.totalorder %s1272_s27, 1  ;;  %p241_p8 = scmp.lt.s32.totalorder %s1272_s27, 3 }
   0xc   : > { %p242_p9 = pnand %p1107_p7, %p241_p8 }
   0xd   : > { %s1109_s19 = sshll.u32 (!%p242_p9), %s1338_s28, 1  ;;  %s270_s18 = sand.u32 (!%p242_p9), 1, %s1264_s25  }
   0xe   : > { %245 = sbr.rel (%p242_p9) target bundleno = 1472 (0x5c0), region = 48  ;;  %p274_p10 = scmp.lt.s32.totalorder (!%p242_p9), %s1109_s19, 3 }
   0xf   : > { %s1031_s9 = scalar_lea.sflag (!%p242_p9), [#allocation3], %s270_s18 }
  0x13   : > { %v282_v0 = vld [vmem:[%s1545_s1] sm:$0xff]  ;;  %v1274_v1 = vmov 0   ;;  %v1275_v3 = vmov 0.0   ;;  %v437_v5 = vld [vmem:[%s1550_s6 + $0x8] sm:$0xff]  ;;  %v1130_v7 = vld [vmem:[%s1550_s6 + $0x10] sm:$0xff]  ;;  %s1559_s19 = smov (!%p274_p10, %s1109_s19), 3 }
  0x14   : > { %1198 = vset.pattern.permute.xlu0 %v1274_v1  ;;  %1199 = vset.pattern.permute.xlu1 %v1274_v1  ;;  %v290_v2 = vld [vmem:[%s1546_s2] sm:$0xff]  ;;  %v1142_v9 = vld [vmem:[%s1548_s4 + $0x30] sm:$0xff]  ;;  %v1148_v11 = vld [vmem:[%s1550_s6 + $0x28] sm:$0xff]  ;;  %s1110_s20 = sshll.u32 %s1559_s19, 3  ;;  %vm302_vm0 = vcmask 64512   ;;  %vm448_vm1 = vcmask 195584  }
  0x15   : > { %285 = vperm.xlu0 %1198, %v282_v0   ;;  %379 = vmatprep.mubr.f32.mxu0 %v1275_v3  ;;  %v404_v4 = vld [vmem:[%s1548_s4] sm:$0xff]  ;;  %v406_v10 = vld [vmem:[%s1548_s4 + $0x10] sm:$0xff]  ;;  %v405_v12 = vld [vmem:[%s1548_s4 + $0x8] sm:$0xff]  ;;  %s277_s23 = scalar_lea.vmem %s1544_s0, %s1110_s20  ;;  %s1108_s19 = sshll.u32 %s270_s18, 4 }
  0x16   : > { %519 = vmatprep.mubr.f32.mxu1 %v1275_v3  ;;  %v1126_v6 = vld [vmem:[%s1548_s4 + $0x20] sm:$0xff]  ;;  %419 = vperm.xlu1 %1199, %v406_v10   ;;  %v1127_v14 = vld [vmem:[%s1548_s4 + $0x28] sm:$0xff]  ;;  %v1125_v15 = vld [vmem:[%s1548_s4 + $0x18] sm:$0xff]  ;;  %s1156_s20 = sshll.u32 %s1338_s28, 8  ;;  %s272_s21 = scalar_lea.vmem [#allocation2], %s1108_s19 }
  0x17   : > { %v1144_v8 = vld [vmem:[%s1548_s4 + $0x40] sm:$0xff]  ;;  %v1131_v16 = vld [vmem:[%s1550_s6 + $0x18] sm:$0xff]  ;;  %v281_v21 = vld [vmem:[%s277_s23 + $0x8] sm:$0xff]  ;;  %s1045_s22 = sshll.u32 %s272_s21, 4  ;;  %s1043_s8 = scalar_lea.hbm %s1551_s7, %s1156_s20  ;;  %s1046_s22 = int_to_ptr.vmem [resolvable:$true] %s1045_s22 }
  0x18   : > { %v436_v13 = vld [vmem:[%s1550_s6] sm:$0xff]  ;;  %v1143_v17 = vld [vmem:[%s1548_s4 + $0x38] sm:$0xff]  ;;  %v299_v28 = vld [vmem:[%s1547_s3 + $0x8] sm:$0xff]  ;;  %s1212_s13 = scalar_lea.vmem %s1046_s22, 256  ;;  %s1276_s28 = smov [#allocation2]  }
  0x19   : > { %293 = vperm.xlu0 %1198, %v290_v2   ;;  %v1147_v18 = vld [vmem:[%s1550_s6 + $0x20] sm:$0xff]  ;;  %v300_v29 = vld [vmem:[%s1547_s3 + $0x10] sm:$0xff]  ;;  %v301_v30 = vld [vmem:[%s1547_s3 + $0x18] sm:$0xff]  ;;  %p1213_p11 = scmp.ne.s32.totalorder %s1046_s22, %s1212_s13  ;;  %s1216_s14 = sshll.u32 %s1276_s28, 4  ;;  %s1217_s14 = int_to_ptr.vmem [resolvable:$false] %s1216_s14 }
  0x1a   : > { %414 = vperm.xlu1 %1199, %v405_v12   ;;  %v280_v20 = vld [vmem:[%s277_s23] sm:$0xff]  ;;  %v435_v55 = vld [vmem:[%s1549_s5 + $0x8] sm:$0xff]  ;;  %s1218_s15 = scalar_lea.vmem %s1217_s14, 512  ;;  %p1219_p0 = scmp.lt.s32.totalorder %s1046_s22, %s1217_s14 }
  0x1b   : > { %v298_v27 = vld [vmem:[%s1547_s3] sm:$0xff]  ;;  %v1118_v12 = vld [vmem:[%s1547_s3 + $0x28] sm:$0xff]  ;;  %p1214_p12 = pnand %p1213_p11, %p1355_p5  ;;  %p1220_p1 = scmp.lt.s32.totalorder %s1218_s15, %s1212_s13 }
  0x1c   : > { %v434_v54 = vld [vmem:[%s1549_s5] sm:$0xff] }
  0x1d   : > { %409 = vperm.xlu0 %1198, %v404_v4   ;;  %p1215_p13 = pneg %p1214_p12  ;;  %p1221_p2 = por %p1220_p1, %p1219_p0 }
  0x1e   : > { %440 = vperm.xlu1 %1199, %v436_v13   ;;  %v1119_v13 = vld [vmem:[%s1547_s3 + $0x30] sm:$0xff] }
  0x1f   : > { %p1222_p3 = pnand %p1221_p2, %p1215_p13 }
  0x21   : > { %445 = vperm.xlu0 %1198, %v437_v5  }
  0x22   : > { %662 = vperm.xlu1 %1199, %v1127_v14   ;;  %v1120_v14 = vld [vmem:[%s1547_s3 + $0x38] sm:$0xff] }
  0x25   : > { %657 = vperm.xlu0 %1198, %v1126_v6  }
  0x26   : > { %652 = vperm.xlu1 %1199, %v1125_v15  }
  0x29   : > { %685 = vperm.xlu0 %1198, %v1130_v7  }
  0x2a   : > { %690 = vperm.xlu1 %1199, %v1131_v16  }
  0x2d   : > { %906 = vperm.xlu0 %1198, %v1144_v8  }
  0x2e   : > { %901 = vperm.xlu1 %1199, %v1143_v17  }
  0x31   : > { %896 = vperm.xlu0 %1198, %v1142_v9  }
  0x32   : > { %929 = vperm.xlu1 %1199, %v1147_v18  }
  0x35   : > { %934 = vperm.xlu0 %1198, %v1148_v11   ;;  %v1117_v11 = vld [vmem:[%s1547_s3 + $0x20] sm:$0xff] }
  0x90   : > { %v286_v19 = vpop.permute.xlu0 %285 }
  0x91   : > { %v288_v22 = vmul.f32 %v286_v19, %v280_v20  ;;  %v289_v23 = vmul.f32 %v286_v19, %v281_v21  ;;  %v420_v35 = vpop.permute.xlu1 %419 }
  0x94   : > { %v294_v24 = vpop.permute.xlu0 %293 }
  0x95   : > { %v297_v25 = vadd.f32 %v294_v24, %v289_v23  ;;  %v296_v26 = vadd.f32 %v294_v24, %v288_v22  ;;  %v415_v39 = vpop.permute.xlu1 %414 }
  0x97   : > { %345 = vmatprep.subr.mxu0 %v297_v25 }
  0x98   : > { %346 = vmatpush1.msra.mxu0 %v296_v26  ;;  %v410_v44 = vpop.permute.xlu0 %409 }
  0x99   : > { %1111 = vmatmul.mubr.msk.f32.vlgmr.msra.gmra.mxu0 %vm302_vm0, %v298_v27  ;;  %v441_v56 = vpop.permute.xlu1 %440 }
  0x9a   : > { %385 = vmatprep.mubr.f32.mxu0 %v1275_v3 }
  0x9c   : > { %v446_v4 = vpop.permute.xlu0 %445 }
  0x9d   : > { %1112 = vmatmul.mubr.msk.f32.gmra.mxu0 %vm302_vm0, %v299_v28  ;;  %v663_v20 = vpop.permute.xlu1 %662 }
  0x9e   : > { %391 = vmatprep.mubr.f32.mxu0 %v1275_v3 }
  0xa0   : > { %v658_v23 = vpop.permute.xlu0 %657 }
  0xa1   : > { %1113 = vmatmul.mubr.msk.f32.gmra.mxu0 %vm302_vm0, %v300_v29  ;;  %v653_v28 = vpop.permute.xlu1 %652 }
  0xa2   : > { %397 = vmatprep.mubr.f32.mxu0 %v1275_v3 }
  0xa5   : > { %1114 = vmatmul.mubr.msk.f32.gmra.mxu0 %vm302_vm0, %v301_v30 }
  0xa6   : > { %763 = vmatprep.mubr.f32.mxu0 %v1275_v3 }
 0x159   : > { %v381_v31 = vpop.f32.mrf.mxu0 }
 0x15b   : > { %v383_v32 = vpop.f32.mrf.mxu0 }
 0x15d   : > { %v387_v33 = vpop.f32.mrf.mxu0 }
 0x15e   : > { %v422_v48 = vadd.f32 %v410_v44, %v387_v33 }
 0x15f   : > { %v389_v34 = vpop.f32.mrf.mxu0 }
 0x160   : > { %v423_v46 = vadd.f32 %v410_v44, %v389_v34  ;;  %v428_v53 = vmax.f32 %v422_v48, 0.0 }
 0x161   : > { %v393_v36 = vpop.f32.mrf.mxu0 }
 0x162   : > { %v424_v45 = vadd.f32 %v415_v39, %v393_v36  ;;  %v429_v52 = vmax.f32 %v423_v46, 0.0 }
 0x163   : > { %v395_v37 = vpop.f32.mrf.mxu0 }
 0x164   : > { %v425_v42 = vadd.f32 %v415_v39, %v395_v37  ;;  %v430_v51 = vmax.f32 %v424_v45, 0.0  ;;  %v1129_v39 = vld [vmem:[%s1549_s5 + $0x18] sm:$0xff] }
 0x165   : > { %v399_v38 = vpop.f32.mrf.mxu0 }
 0x166   : > { %v426_v40 = vadd.f32 %v420_v35, %v399_v38  ;;  %v431_v50 = vmax.f32 %v425_v42, 0.0  ;;  %v1128_v38 = vld [vmem:[%s1549_s5 + $0x10] sm:$0xff] }
 0x167   : > { %v401_v41 = vpop.f32.mrf.mxu0 }
 0x168   : > { %v427_v43 = vadd.f32 %v420_v35, %v401_v41  ;;  %v432_v49 = vmax.f32 %v426_v40, 0.0  ;;  %v686_v40 = vpop.permute.xlu0 %685 }
 0x16a   : > { %v433_v47 = vmax.f32 %v427_v43, 0.0 }
 0x16c   : > { %481 = vmatprep.subr.mxu1 %v433_v47 }
 0x16d   : > { %482 = vmatpush1.msra.mxu1 %v432_v49 }
 0x16e   : > { %483 = vmatprep.subr.mxu1 %v431_v50 }
 0x16f   : > { %484 = vmatpush1.msra.mxu1 %v430_v51  ;;  %v691_v51 = vpop.permute.xlu1 %690 }
 0x170   : > { %485 = vmatprep.subr.mxu1 %v429_v52 }
 0x171   : > { %486 = vmatpush1.msra.mxu1 %v428_v53 }
 0x172   : > { %1115 = vmatmul.mubr.msk.f32.vlgmr.msra.gmra.mxu1 %vm448_vm1, %v434_v54 }
 0x173   : > { %525 = vmatprep.mubr.f32.mxu1 %v1275_v3 }
 0x176   : > { %1116 = vmatmul.mubr.msk.f32.gmra.mxu1 %vm448_vm1, %v435_v55 }
 0x177   : > { %621 = vmatprep.mubr.f32.mxu1 %v1275_v3 }
 0x232   : > { %v521_v57 = vpop.f32.mrf.mxu1 }
 0x233   : > { %v522_v58 = vadd.f32 %v521_v57, %v441_v56 }
 0x234   : > { %v523_v59 = vpop.f32.mrf.mxu1 }
 0x235   : > { %1200 = vtanh.f32 %v522_v58  ;;  %v524_v60 = vadd.f32 %v523_v59, %v441_v56  ;;  %v1134_v58 = vld [vmem:[%s1547_s3 + $0x40] sm:$0xff]  ;;  %v1135_v59 = vld [vmem:[%s1547_s3 + $0x48] sm:$0xff] }
 0x236   : > { %v527_v61 = vpop.f32.mrf.mxu1 }
 0x237   : > { %1202 = vtanh.f32 %v524_v60  ;;  %v528_v8 = vadd.f32 %v527_v61, %v446_v4  ;;  %v1136_v60 = vld [vmem:[%s1547_s3 + $0x50] sm:$0xff]  ;;  %v1137_v61 = vld [vmem:[%s1547_s3 + $0x58] sm:$0xff] }
 0x238   : > { %v529_v1 = vpop.f32.mrf.mxu1 }
 0x239   : > { %v530_v6 = vadd.f32 %v529_v1, %v446_v4  ;;  %v907_v4 = vpop.permute.xlu0 %906 }
 0x242   : > { %v1201_v62 = vpop.eup %1200 }
 0x243   : > { %v534_v63 = vadd.f32 1.0, %v1201_v62 }
 0x244   : > { %v1203_v0 = vpop.eup %1202 }
 0x245   : > { %v535_v2 = vadd.f32 1.0, %v1203_v0  ;;  %v536_v5 = vmul.f32 %v534_v63, %v381_v31 }
 0x247   : > { %v537_v7 = vmul.f32 %v535_v2, %v383_v32  ;;  %v538_v10 = vadd.f32 %v536_v5, %v528_v8 }
 0x249   : > { %v539_v9 = vadd.f32 %v537_v7, %v530_v6  ;;  %v902_v7 = vpop.permute.xlu1 %901 }
 0x24b   : > { %587 = vmatprep.subr.mxu1 %v539_v9 }
 0x24c   : > { %588 = vmatpush1.msra.mxu1 %v538_v10 }
 0x24d   : > { %1121 = vmatmul.mubr.msk.f32.vlgmr.msra.gmra.mxu1 %vm302_vm0, %v1117_v11 }
 0x24e   : > { %627 = vmatprep.mubr.f32.mxu1 %v1275_v3 }
 0x251   : > { %1122 = vmatmul.mubr.msk.f32.gmra.mxu1 %vm302_vm0, %v1118_v12  ;;  %v897_v12 = vpop.permute.xlu0 %896 }
 0x252   : > { %633 = vmatprep.mubr.f32.mxu1 %v1275_v3 }
 0x255   : > { %1123 = vmatmul.mubr.msk.f32.gmra.mxu1 %vm302_vm0, %v1119_v13 }
 0x256   : > { %639 = vmatprep.mubr.f32.mxu1 %v1275_v3 }
 0x259   : > { %1124 = vmatmul.mubr.msk.f32.gmra.mxu1 %vm302_vm0, %v1120_v14 }
 0x25a   : > { %1007 = vmatprep.mubr.f32.mxu1 %v1275_v3 }
 0x30d   : > { %v623_v15 = vpop.f32.mrf.mxu1 }
 0x30f   : > { %v625_v16 = vpop.f32.mrf.mxu1 }
 0x311   : > { %v629_v17 = vpop.f32.mrf.mxu1 }
 0x312   : > { %v665_v32 = vadd.f32 %v653_v28, %v629_v17 }
 0x313   : > { %v631_v18 = vpop.f32.mrf.mxu1 }
 0x314   : > { %v666_v30 = vadd.f32 %v653_v28, %v631_v18  ;;  %v671_v37 = vmax.f32 %v665_v32, 0.0  ;;  %v935_v32 = vpop.permute.xlu0 %934 }
 0x315   : > { %v635_v19 = vpop.f32.mrf.mxu1 }
 0x316   : > { %v667_v29 = vadd.f32 %v658_v23, %v635_v19  ;;  %v672_v36 = vmax.f32 %v666_v30, 0.0 }
 0x317   : > { %v637_v21 = vpop.f32.mrf.mxu1 }
 0x318   : > { %v668_v26 = vadd.f32 %v658_v23, %v637_v21  ;;  %v673_v35 = vmax.f32 %v667_v29, 0.0  ;;  %v1146_v23 = vld [vmem:[%s1549_s5 + $0x28] sm:$0xff] }
 0x319   : > { %v641_v22 = vpop.f32.mrf.mxu1 }
 0x31a   : > { %v669_v24 = vadd.f32 %v663_v20, %v641_v22  ;;  %v674_v34 = vmax.f32 %v668_v26, 0.0  ;;  %v1145_v22 = vld [vmem:[%s1549_s5 + $0x20] sm:$0xff] }
 0x31b   : > { %v643_v25 = vpop.f32.mrf.mxu1 }
 0x31c   : > { %v670_v27 = vadd.f32 %v663_v20, %v643_v25  ;;  %v675_v33 = vmax.f32 %v669_v24, 0.0  ;;  %v930_v24 = vpop.permute.xlu1 %929 }
 0x31e   : > { %v676_v31 = vmax.f32 %v670_v27, 0.0 }
 0x320   : > { %725 = vmatprep.subr.mxu0 %v676_v31 }
 0x321   : > { %726 = vmatpush1.msra.mxu0 %v675_v33 }
 0x322   : > { %727 = vmatprep.subr.mxu0 %v674_v34 }
 0x323   : > { %728 = vmatpush1.msra.mxu0 %v673_v35 }
 0x324   : > { %729 = vmatprep.subr.mxu0 %v672_v36 }
 0x325   : > { %730 = vmatpush1.msra.mxu0 %v671_v37 }
 0x326   : > { %1132 = vmatmul.mubr.msk.f32.vlgmr.msra.gmra.mxu0 %vm448_vm1, %v1128_v38 }
 0x327   : > { %769 = vmatprep.mubr.f32.mxu0 %v1275_v3 }
 0x32a   : > { %1133 = vmatmul.mubr.msk.f32.gmra.mxu0 %vm448_vm1, %v1129_v39 }
 0x32b   : > { %865 = vmatprep.mubr.f32.mxu0 %v1275_v3 }
 0x3e6   : > { %v765_v41 = vpop.f32.mrf.mxu0 }
 0x3e7   : > { %v766_v42 = vadd.f32 %v765_v41, %v686_v40 }
 0x3e8   : > { %v767_v43 = vpop.f32.mrf.mxu0 }
 0x3e9   : > { %1204 = vtanh.f32 %v766_v42  ;;  %v768_v44 = vadd.f32 %v767_v43, %v686_v40 }
 0x3ea   : > { %v771_v45 = vpop.f32.mrf.mxu0 }
 0x3eb   : > { %1206 = vtanh.f32 %v768_v44  ;;  %v772_v55 = vadd.f32 %v771_v45, %v691_v51 }
 0x3ec   : > { %v773_v49 = vpop.f32.mrf.mxu0 }
 0x3ed   : > { %v774_v53 = vadd.f32 %v773_v49, %v691_v51 }
 0x3f6   : > { %v1205_v46 = vpop.eup %1204 }
 0x3f7   : > { %v778_v47 = vadd.f32 1.0, %v1205_v46 }
 0x3f8   : > { %v1207_v48 = vpop.eup %1206 }
 0x3f9   : > { %v779_v50 = vadd.f32 1.0, %v1207_v48  ;;  %v780_v52 = vmul.f32 %v778_v47, %v623_v15 }
 0x3fb   : > { %v781_v54 = vmul.f32 %v779_v50, %v625_v16  ;;  %v782_v57 = vadd.f32 %v780_v52, %v772_v55 }
 0x3fd   : > { %v783_v56 = vadd.f32 %v781_v54, %v774_v53 }
 0x3ff   : > { %831 = vmatprep.subr.mxu0 %v783_v56 }
 0x400   : > { %832 = vmatpush1.msra.mxu0 %v782_v57 }
 0x401   : > { %1138 = vmatmul.mubr.msk.f32.vlgmr.msra.gmra.mxu0 %vm302_vm0, %v1134_v58 }
 0x402   : > { %871 = vmatprep.mubr.f32.mxu0 %v1275_v3 }
 0x405   : > { %1139 = vmatmul.mubr.msk.f32.gmra.mxu0 %vm302_vm0, %v1135_v59 }
 0x406   : > { %877 = vmatprep.mubr.f32.mxu0 %v1275_v3 }
 0x409   : > { %1140 = vmatmul.mubr.msk.f32.gmra.mxu0 %vm302_vm0, %v1136_v60 }
 0x40a   : > { %883 = vmatprep.mubr.f32.mxu0 %v1275_v3 }
 0x40d   : > { %1141 = vmatmul.mubr.msk.f32.gmra.mxu0 %vm302_vm0, %v1137_v61 }
 0x4c1   : > { %v867_v62 = vpop.f32.mrf.mxu0 }
 0x4c3   : > { %v869_v63 = vpop.f32.mrf.mxu0 }
 0x4c5   : > { %v873_v0 = vpop.f32.mrf.mxu0 }
 0x4c6   : > { %v909_v16 = vadd.f32 %v897_v12, %v873_v0 }
 0x4c7   : > { %v875_v1 = vpop.f32.mrf.mxu0 }
 0x4c8   : > { %v910_v14 = vadd.f32 %v897_v12, %v875_v1  ;;  %v915_v21 = vmax.f32 %v909_v16, 0.0 }
 0x4c9   : > { %v879_v2 = vpop.f32.mrf.mxu0 }
 0x4ca   : > { %v911_v13 = vadd.f32 %v902_v7, %v879_v2  ;;  %v916_v20 = vmax.f32 %v910_v14, 0.0 }
 0x4cb   : > { %v881_v5 = vpop.f32.mrf.mxu0 }
 0x4cc   : > { %v912_v10 = vadd.f32 %v902_v7, %v881_v5  ;;  %v917_v19 = vmax.f32 %v911_v13, 0.0 }
 0x4cd   : > { %v885_v6 = vpop.f32.mrf.mxu0 }
 0x4ce   : > { %v913_v8 = vadd.f32 %v907_v4, %v885_v6  ;;  %v918_v18 = vmax.f32 %v912_v10, 0.0 }
 0x4cf   : > { %v887_v9 = vpop.f32.mrf.mxu0 }
 0x4d0   : > { %v914_v11 = vadd.f32 %v907_v4, %v887_v9  ;;  %v919_v17 = vmax.f32 %v913_v8, 0.0 }
 0x4d2   : > { %v920_v15 = vmax.f32 %v914_v11, 0.0 }
 0x4d4   : > { %969 = vmatprep.subr.mxu1 %v920_v15 }
 0x4d5   : > { %970 = vmatpush1.msra.mxu1 %v919_v17 }
 0x4d6   : > { %971 = vmatprep.subr.mxu1 %v918_v18 }
 0x4d7   : > { %972 = vmatpush1.msra.mxu1 %v917_v19 }
 0x4d8   : > { %973 = vmatprep.subr.mxu1 %v916_v20 }
 0x4d9   : > { %974 = vmatpush1.msra.mxu1 %v915_v21 }
 0x4da   : > { %1149 = vmatmul.mubr.msk.f32.vlgmr.msra.gmra.mxu1 %vm448_vm1, %v1145_v22 }
 0x4db   : > { %1013 = vmatprep.mubr.f32.mxu1 %v1275_v3 }
 0x4de   : > { %1150 = vmatmul.mubr.msk.f32.gmra.mxu1 %vm448_vm1, %v1146_v23 }
 0x59a   : > { %v1009_v25 = vpop.f32.mrf.mxu1 }
 0x59b   : > { %v1010_v26 = vadd.f32 %v1009_v25, %v930_v24 }
 0x59c   : > { %v1011_v27 = vpop.f32.mrf.mxu1 }
 0x59d   : > { %1208 = vtanh.f32 %v1010_v26  ;;  %v1012_v28 = vadd.f32 %v1011_v27, %v930_v24 }
 0x59e   : > { %v1015_v29 = vpop.f32.mrf.mxu1 }
 0x59f   : > { %1210 = vtanh.f32 %v1012_v28  ;;  %v1016_v35 = vadd.f32 %v1015_v29, %v935_v32 }
 0x5a0   : > { %v1017_v33 = vpop.f32.mrf.mxu1 }
 0x5a1   : > { %v1018_v38 = vadd.f32 %v1017_v33, %v935_v32 }
 0x5aa   : > { %v1209_v30 = vpop.eup %1208 }
 0x5ab   : > { %v1022_v31 = vadd.f32 1.0, %v1209_v30 }
 0x5ac   : > { %v1211_v3 = vpop.eup %1210 }
 0x5ad   : > { %v1023_v34 = vadd.f32 1.0, %v1211_v3  ;;  %v1024_v36 = vmul.f32 %v1022_v31, %v867_v62 }
 0x5af   : > { %v1026_v37 = vadd.f32 %v1024_v36, %v1016_v35  ;;  %v1025_v39 = vmul.f32 %v1023_v34, %v869_v63 }
 0x5b1   : > { %1028 = vst [vmem:[%s272_s21] sm:$0xff] %v1026_v37  ;;  %v1027_v40 = vadd.f32 %v1025_v39, %v1018_v38 }
 0x5b3   : > { %1029 = vst [vmem:[%s272_s21 + $0x8] sm:$0xff] %v1027_v40 }
 0x5b4   : > { %1225 = shalt.err (!%p1222_p3)
}
 0x5b5   : > { %s1226_s16 = scalar_lea.hbm %s1043_s8, 256  ;;  %s1230_s19 = scalar_lea.hbm %s1551_s7, 512 }
 0x5b6   : > { %p1227_p4 = scmp.ne.s32.totalorder %s1043_s8, %s1226_s16  ;;  %p1231_p9 = scmp.lt.s32.totalorder %s1043_s8, %s1551_s7 }
 0x5b7   : > { %p1232_p10 = scmp.lt.s32.totalorder %s1230_s19, %s1226_s16 }
 0x5b8   : > { %p1228_p7 = pnand %p1227_p4, %p1355_p5 }
 0x5b9   : > { %p1233_p11 = por %p1232_p10, %p1231_p9 }
 0x5ba   : > { %p1229_p8 = pneg %p1228_p7 }
 0x5bc   : > { %p1234_p12 = pnand %p1233_p11, %p1229_p8 }
 0x5be   : > { %1237 = shalt.err (!%p1234_p12)
}
 0x5bf   : > { %1157 = dma.vmem_to_hbm [thread:$0]  (%p1355_p5), %s1046_s22, 256, %s1043_s8, %s1031_s9  }
 0x5c0 PF: > { %p1163_p13 = scmp.ge.s32.totalorder %s1272_s27, 2  ;;  %s1057_s23 = sand.u32 1, %s1260_s24  }
 0x5c1   : > { %s1058_s29 = scalar_lea.sflag [#allocation3], %s1057_s23 }
 0x5c2   : > { %p1160_p0 = pnand %p1163_p13, %p1359_p6 }
 0x5c4   : > { %p1161_p1 = pneg %p1160_p0 }
 0x5c6   : > { %1255 = dma.done.wait (%p1161_p1), %s1058_s29, 256  }
 0x5c7   : > { %1257 = vsyncadd (%p1161_p1), %s1058_s29, 4294967040  ;;  %p17_p2 = scmp.ge.s32.totalorder %s1342_s30, 4   ;;  %s1554_s24 = smov %s1264_s25 }
 0x5c8   : > { %s1555_s25 = smov %s1268_s26  ;;  %s1556_s26 = smov %s1353_s10 }
 0x5c9   : > { %s1557_s27 = smov %s1342_s30  ;;  %19 = sbr.rel (!%p17_p2) target bundleno = 3 (0x3), region = 91 }
 0x5ce   :  { %1063 = vsyncpa [#allocation3], 1 }
 0x5cf   :  { %1065 = vsyncpa [#allocation3 + $0x1], 1 }

</bundles_post_ra>
